<compile_context>
chip_gen: v7x
topology: tpu7x:2x2x1
jax: 0.10.0
libtpu: 0.0.40
codegen_flags: <defaults>
</compile_context>

<pallas_src>
import functools

import jax
import jax.numpy as jnp
from jax.experimental import pallas as pl
from jax.experimental.pallas import tpu as pltpu


# ----------------------------------------------------------------------------
# Pallas kernels
# ----------------------------------------------------------------------------

def _linear_kernel(x_ref, w_ref, b_ref, o_ref, *, relu):
    # x: (tile, Cin), w: (Cin, Cout), b: (1, Cout)
    y = jnp.dot(x_ref[...], w_ref[...], preferred_element_type=jnp.float32)
    y = y + b_ref[...]
    if relu:
        y = jnp.maximum(y, 0.0)
    o_ref[...] = y.astype(o_ref.dtype)


def _linear_res_relu_kernel(x_ref, w_ref, b_ref, r_ref, o_ref):
    # Fused 1x1-conv + residual add + ReLU:  o = relu(x @ w + b + r)
    y = jnp.dot(x_ref[...], w_ref[...], preferred_element_type=jnp.float32)
    y = y + b_ref[...] + r_ref[...]
    o_ref[...] = jnp.maximum(y, 0.0).astype(o_ref.dtype)


def _mlp_head_kernel(x_ref, w1_ref, b1_ref, w2_ref, b2_ref, o_ref):
    # Fused fc1(+ReLU) -> fc2; the (tile, 128) intermediate stays in VMEM/vregs.
    h = jnp.dot(x_ref[...], w1_ref[...], preferred_element_type=jnp.float32)
    h = jnp.maximum(h + b1_ref[...], 0.0)
    y = jnp.dot(h.astype(w2_ref.dtype), w2_ref[...], preferred_element_type=jnp.float32)
    o_ref[...] = (y + b2_ref[...]).astype(o_ref.dtype)


def _spectral_group_kernel(x_ref, w_ref, o_ref):
    # One block-diagonally packed mode group per grid step:
    #   x: (1, B, k*2Cin), w: (1, k*2Cin, k*2Cout) -> o: (1, B, k*2Cout)
    # Plain 2-D dot -> guaranteed MXU lowering; lane-dense (>=128-wide) I/O.
    y = jnp.dot(x_ref[0], w_ref[0], preferred_element_type=jnp.float32)
    o_ref[0] = y.astype(o_ref.dtype)


# ----------------------------------------------------------------------------
# Pallas-backed ops
# ----------------------------------------------------------------------------

_ROW_TILE_CAP = 4096  # per-buffer <= 4096*width*4B; fits scoped VMEM on v5e/v6e/v7x


def _row_grid(n_rows, cap=_ROW_TILE_CAP):
    """Row tile + grid size; ragged last block is handled by Pallas masking."""
    tile = n_rows if n_rows <= cap else cap
    return tile, pl.cdiv(n_rows, tile)


def pointwise_linear(x_flat, w, b, residual=None, relu=False, out_dtype=jnp.float32):
    """Channel-mixing linear on (N, Cin) channels-last-flattened activations.

    Equivalent to nn.Linear over channels / a 1x1 conv. If `residual` is given,
    computes relu(x @ w + b + residual) in one fused kernel. The matmul runs in
    w.dtype (bf16 in the FNO trunk) with f32 accumulation; bias/residual stay f32.
    """
    n, cin = x_flat.shape
    cout = w.shape[1]
    cdt = w.dtype
    tile, gsz = _row_grid(n)

    in_specs = [
        pl.BlockSpec((tile, cin), lambda i: (i, 0)),
        pl.BlockSpec((cin, cout), lambda i: (0, 0)),
        pl.BlockSpec((1, cout), lambda i: (0, 0)),
    ]
    args = [x_flat.astype(cdt), w, b.reshape(1, cout).astype(jnp.float32)]
    if residual is not None:
        kernel = _linear_res_relu_kernel
        in_specs.append(pl.BlockSpec((tile, cout), lambda i: (i, 0)))
        args.append(residual)
    else:
        kernel = functools.partial(_linear_kernel, relu=relu)

    return pl.pallas_call(
        kernel,
        out_shape=jax.ShapeDtypeStruct((n, cout), out_dtype),
        grid=(gsz,),
        in_specs=in_specs,
        out_specs=pl.BlockSpec((tile, cout), lambda i: (i, 0)),
        compiler_params=pltpu.CompilerParams(
            dimension_semantics=("parallel",),
            vmem_limit_bytes=32 * 1024 * 1024),
    )(*args)


def fused_mlp_head(x_flat, w1, b1, w2, b2, out_dtype=jnp.float32):
    """Fused fc1(+ReLU) -> fc2: avoids the (N, 128) HBM round-trip between them."""
    n, cin = x_flat.shape
    hmid = w1.shape[1]
    cout = w2.shape[1]
    cdt = w1.dtype
    tile, gsz = _row_grid(n)

    return pl.pallas_call(
        _mlp_head_kernel,
        out_shape=jax.ShapeDtypeStruct((n, cout), out_dtype),
        grid=(gsz,),
        in_specs=[
            pl.BlockSpec((tile, cin), lambda i: (i, 0)),
            pl.BlockSpec((cin, hmid), lambda i: (0, 0)),
            pl.BlockSpec((1, hmid), lambda i: (0, 0)),
            pl.BlockSpec((hmid, cout), lambda i: (0, 0)),
            pl.BlockSpec((1, cout), lambda i: (0, 0)),
        ],
        out_specs=pl.BlockSpec((tile, cout), lambda i: (i, 0)),
        compiler_params=pltpu.CompilerParams(
            dimension_semantics=("parallel",),
            vmem_limit_bytes=32 * 1024 * 1024),
    )(x_flat.astype(cdt), w1, b1.reshape(1, hmid).astype(jnp.float32),
      w2, b2.reshape(1, cout).astype(jnp.float32))


# ----------------------------------------------------------------------------
# SpectralConv: weight packing (done ONCE, outside the forward pass) + forward
# ----------------------------------------------------------------------------

def pack_spectral_weights(w1, w2, *, lane_target=256, dtype=jnp.float32):
    """Precompute the real, mode-grouped, block-diagonal spectral weight slab.

    w1, w2: (Cin, Cout, m1, m2) complex64 (the PyTorch module's parameters).
    Returns (w_packed, k):
      w_packed: (G, k*2Cin, k*2Cout) real, where each group packs k Fourier modes
                block-diagonally; k is sized so k*2Cin ~= lane_target (MXU width).
      k:        modes per group (Python int).
    """
    cin, cout, m1, m2 = w1.shape
    M = 2 * m1 * m2
    ws = jnp.concatenate([w1, w2], axis=2)                            # (Cin,Cout,2m1,m2)
    w_modes = jnp.transpose(ws, (2, 3, 0, 1)).reshape(M, cin, cout)   # (M,Cin,Cout) c64
    wr = jnp.real(w_modes).astype(jnp.float32)
    wi = jnp.imag(w_modes).astype(jnp.float32)
    # Real 2x2 block form of the complex multiply: [re,im] @ [[wr, wi], [-wi, wr]]
    w_blk = jnp.concatenate(
        [jnp.concatenate([wr, wi], axis=-1),
         jnp.concatenate([-wi, wr], axis=-1)], axis=-2)               # (M, 2Cin, 2Cout)

    k = max(1, min(M, lane_target // (2 * cin)))
    G = -(-M // k)
    pad = G * k - M
    if pad:
        w_blk = jnp.pad(w_blk, ((0, pad), (0, 0), (0, 0)))
    w_grp = w_blk.reshape(G, k, 2 * cin, 2 * cout)
    eye = jnp.eye(k, dtype=w_grp.dtype)
    w_packed = jnp.einsum('gkio,kl->gkilo', w_grp, eye)               # block-diagonal
    w_packed = w_packed.reshape(G, k * 2 * cin, k * 2 * cout)
    return w_packed.astype(dtype), k


def spectral_conv2d_nhwc(x, w_packed, k, m1, m2, cout):
    """SpectralConv forward (in_spatial=2) on a channels-last input.

    x: (B, H, W, Cin); w_packed/k: from pack_spectral_weights (hoisted out of the
    forward). Returns (B, H, W, Cout) float32.
    """
    B, H, W, Cin = x.shape
    Wf = W // 2 + 1
    M = 2 * m1 * m2
    G = w_packed.shape[0]
    cdt = w_packed.dtype
    assert 2 * m1 <= H, "top/bottom mode blocks would overlap (H < 2*m1)"
    assert m2 <= Wf

    # TODO(synk): rfft2/irfft2 stay in plain JAX -- no Pallas FFT primitive on TPU.
    # TODO(synk): at scale (m1,m2 << H,W) replace with truncated-DFT matmuls on the MXU.
    x_ft = jnp.fft.rfft2(x.astype(jnp.float32), axes=(1, 2))          # (B,H,Wf,Cin) c64

    # Kept low/high-frequency blocks, modes-major, real 2x2 layout, grouped k at a time.
    xs = jnp.concatenate([x_ft[:, :m1, :m2, :],
                          x_ft[:, H - m1:, :m2, :]], axis=1)          # (B, 2m1, m2, Cin)
    x_modes = jnp.transpose(xs, (1, 2, 0, 3)).reshape(M, B, Cin)
    xr2 = jnp.concatenate([jnp.real(x_modes), jnp.imag(x_modes)], axis=-1)  # (M,B,2Cin)
    pad = G * k - M
    if pad:
        xr2 = jnp.pad(xr2, ((0, pad), (0, 0), (0, 0)))
    x_packed = (xr2.reshape(G, k, B, 2 * Cin)
                   .transpose(0, 2, 1, 3)
                   .reshape(G, B, k * 2 * Cin)).astype(cdt)

    y_packed = pl.pallas_call(
        _spectral_group_kernel,
        out_shape=jax.ShapeDtypeStruct((G, B, k * 2 * cout), jnp.float32),
        grid=(G,),
        in_specs=[
            pl.BlockSpec((1, B, k * 2 * Cin), lambda g: (g, 0, 0)),
            pl.BlockSpec((1, k * 2 * Cin, k * 2 * cout), lambda g: (g, 0, 0)),
        ],
        out_specs=pl.BlockSpec((1, B, k * 2 * cout), lambda g: (g, 0, 0)),
        compiler_params=pltpu.CompilerParams(dimension_semantics=("parallel",)),
    )(x_packed, w_packed)

    y = (y_packed.reshape(G, B, k, 2 * cout)
                 .transpose(0, 2, 1, 3)
                 .reshape(G * k, B, 2 * cout))[:M]                    # (M, B, 2Cout)
    out_modes = (y[..., :cout] + 1j * y[..., cout:]).astype(jnp.complex64)
    out_modes = jnp.transpose(out_modes.reshape(2 * m1, m2, B, cout),
                              (2, 0, 1, 3))                           # (B, 2m1, m2, Cout)
    top, bot = out_modes[:, :m1], out_modes[:, m1:]

    # Full spectrum via concat + pad (no zeros array + scatter updates).
    mid = jnp.zeros((B, H - 2 * m1, m2, cout), jnp.complex64)
    col = jnp.concatenate([top, mid, bot], axis=1)                    # (B, H, m2, Cout)
    out_ft = jnp.pad(col, ((0, 0), (0, 0), (0, Wf - m2), (0, 0)))
    return jnp.fft.irfft2(out_ft, s=(H, W), axes=(1, 2)).astype(jnp.float32)


def spectral_conv2d(x_nchw, w_packed, k, m1, m2, cout):
    """SpectralConv forward matching the PyTorch module layout (NCHW in / NCHW out).

    Takes the pre-packed weight slab (pack_spectral_weights) so no weight re-layout
    runs inside the forward pass.
    """
    y = spectral_conv2d_nhwc(jnp.transpose(x_nchw, (0, 2, 3, 1)), w_packed, k, m1, m2, cout)
    return jnp.transpose(y, (0, 3, 1, 2))


def spectral_conv2d_ref(x, w1, w2, m1, m2):
    """Pure-JAX reference mirroring the PyTorch module (NCHW, f32/complex64)."""
    B, Cin, H, W = x.shape
    Cout = w1.shape[1]
    x_ft = jnp.fft.rfft2(x, axes=(-2, -1))
    out_ft = jnp.zeros((B, Cout, H, W // 2 + 1), jnp.complex64)
    out_ft = out_ft.at[:, :, :m1, :m2].set(
        jnp.einsum('bixy,ioxy->boxy', x_ft[:, :, :m1, :m2], w1))
    out_ft = out_ft.at[:, :, -m1:, :m2].set(
        jnp.einsum('bixy,ioxy->boxy', x_ft[:, :, -m1:, :m2], w2))
    return jnp.fft.irfft2(out_ft, s=(H, W), axes=(-2, -1)).astype(jnp.float32)


# ----------------------------------------------------------------------------
# FNO (in_spatial=2, activation=ReLU, batch_norm=False -> Identity)
# ----------------------------------------------------------------------------

def init_fno_params(key, in_channels, out_channels, width, modes):
    m1, m2 = modes
    ks = jax.random.split(key, 16)
    p = {}
    p['fc0_w'] = (0.1 * jax.random.normal(ks[0], (in_channels + 2, width),
                                          jnp.float32)).astype(jnp.bfloat16)
    p['fc0_b'] = jnp.zeros((width,), jnp.float32)
    scale = 1.0 / (width * width)
    for i in range(4):
        p[f'w{i}_w'] = (0.1 * jax.random.normal(ks[1 + 3 * i], (width, width),
                                                jnp.float32)).astype(jnp.bfloat16)
        p[f'w{i}_b'] = jnp.zeros((width,), jnp.float32)
        kr1, ki1 = jax.random.split(ks[2 + 3 * i])
        kr2, ki2 = jax.random.split(ks[3 + 3 * i])
        w1c = (scale * (jax.random.normal(kr1, (width, width, m1, m2))
                        + 1j * jax.random.normal(ki1, (width, width, m1, m2)))
               ).astype(jnp.complex64)
        w2c = (scale * (jax.random.normal(kr2, (width, width, m1, m2))
                        + 1j * jax.random.normal(ki2, (width, width, m1, m2)))
               ).astype(jnp.complex64)
        # Hoisted weight preprocessing: store the packed real slab, not the complex weights.
        wp, _ = pack_spectral_weights(w1c, w2c, dtype=jnp.bfloat16)
        p[f'conv{i}_wp'] = wp
    p['fc1_w'] = (0.1 * jax.random.normal(ks[13], (width, 128), jnp.float32)
                  ).astype(jnp.bfloat16)
    p['fc1_b'] = jnp.zeros((128,), jnp.float32)
    p['fc2_w'] = (0.1 * jax.random.normal(ks[14], (128, out_channels), jnp.float32)
                  ).astype(jnp.bfloat16)
    p['fc2_b'] = jnp.zeros((out_channels,), jnp.float32)
    return p


def fno_forward(params, x, modes=(4, 4)):
    m1, m2 = modes
    B, C, H, W = x.shape
    width = params['fc0_w'].shape[1]
    out_c = params['fc2_w'].shape[1]

    # NCHW -> NHWC once; everything stays channels-last internally.
    x = jnp.transpose(x, (0, 2, 3, 1))                                # (B, H, W, C)
    gy = jnp.linspace(0.0, 1.0, H, dtype=jnp.float32)
    gx = jnp.linspace(0.0, 1.0, W, dtype=jnp.float32)
    g0 = jnp.broadcast_to(gy[None, :, None, None], (B, H, W, 1))      # varies along H
    g1 = jnp.broadcast_to(gx[None, None, :, None], (B, H, W, 1))      # varies along W
    x = jnp.concatenate([x, g0, g1], axis=-1)                         # (B, H, W, C+2)

    N = B * H * W
    h = pointwise_linear(x.reshape(N, C + 2), params['fc0_w'], params['fc0_b'],
                         out_dtype=jnp.bfloat16)

    for i in range(4):
        wp = params[f'conv{i}_wp']
        kpm = wp.shape[1] // (2 * width)                              # modes per group
        x2 = spectral_conv2d_nhwc(h.reshape(B, H, W, width), wp, kpm, m1, m2, width)
        # Fused: relu(h @ w_i + b_i + spectral)   (bn = Identity, batch_norm=False)
        h = pointwise_linear(h, params[f'w{i}_w'], params[f'w{i}_b'],
                             residual=x2.reshape(N, width),           # residual stays f32
                             out_dtype=jnp.bfloat16)

    out = fused_mlp_head(h, params['fc1_w'], params['fc1_b'],
                         params['fc2_w'], params['fc2_b'], out_dtype=jnp.float32)
    return jnp.transpose(out.reshape(B, H, W, out_c), (0, 3, 1, 2))   # NCHW out


if __name__ == "__main__":
    key = jax.random.PRNGKey(0)
    k_param, k_x, k_w1, k_w2 = jax.random.split(key, 4)

    batch, in_channels, out_channels = 2, 4, 3
    width, modes, H, W = 32, (4, 4), 16, 16
    m1, m2 = modes

    x = jax.random.normal(k_x, (batch, in_channels, H, W), jnp.float32)

    # --- Standalone SpectralConv (the spec module, in_spatial=2, f32) --------
    scale = 1.0 / (in_channels * out_channels)
    kr1, ki1 = jax.random.split(k_w1)
    kr2, ki2 = jax.random.split(k_w2)
    w1 = (scale * (jax.random.normal(kr1, (in_channels, out_channels, m1, m2))
                   + 1j * jax.random.normal(ki1, (in_channels, out_channels, m1, m2)))
          ).astype(jnp.complex64)
    w2 = (scale * (jax.random.normal(kr2, (in_channels, out_channels, m1, m2))
                   + 1j * jax.random.normal(ki2, (in_channels, out_channels, m1, m2)))
          ).astype(jnp.complex64)

    # Weight packing hoisted out of the forward (done once, outside jit).
    w_packed, kpm = pack_spectral_weights(w1, w2, dtype=jnp.float32)
    sc_fn = jax.jit(functools.partial(spectral_conv2d, k=kpm, m1=m1, m2=m2,
                                      cout=out_channels))
    sc = jax.block_until_ready(sc_fn(x, w_packed))
    assert sc.shape == (batch, out_channels, H, W), sc.shape
    assert sc.dtype == jnp.float32

    ref = jax.block_until_ready(spectral_conv2d_ref(x, w1, w2, m1, m2))
    assert jnp.allclose(sc, ref, atol=1e-3, rtol=1e-3), \
        float(jnp.max(jnp.abs(sc - ref)))

    # --- Full FNO-style forward (SpectralConv inside 4 blocks, bf16 trunk) ---
    params = init_fno_params(k_param, in_channels, out_channels, width, modes)
    fwd = jax.jit(functools.partial(fno_forward, modes=modes))
    out = jax.block_until_ready(fwd(params, x))
    assert out.shape == (batch, out_channels, H, W), out.shape
    assert out.dtype == jnp.float32
    print("KERNEL_OK")
</pallas_src>

<mosaic_0001>
module attributes {stable_mosaic.version = 11 : i64} {
  func.func @_spectral_group_kernel(%arg0: i32, %arg1: memref<1x2x256xf32, #tpu.memory_space<vmem>>, %arg2: memref<1x256x192xf32, #tpu.memory_space<vmem>>, %arg3: memref<1x2x192xf32, #tpu.memory_space<vmem>>) attributes {dimension_semantics = [#tpu.dimension_semantics<parallel>], iteration_bounds = array<i64: 1>, scalar_prefetch = 0 : i64, scratch_operands = 0 : i64, tpu.core_type = #tpu.core_type<tc>, window_params = [{transform_indices = @transform_0, window_bounds = array<i64: 1, 2, 256>}, {transform_indices = @transform_1, window_bounds = array<i64: 1, 256, 192>}, {transform_indices = @transform_2, window_bounds = array<i64: 1, 2, 192>}]} {
    %c0 = arith.constant 0 : index
    %c0_0 = arith.constant 0 : index
    %c0_1 = arith.constant 0 : index
    %0 = vector.load %arg1[%c0, %c0_0, %c0_1] : memref<1x2x256xf32, #tpu.memory_space<vmem>>, vector<1x2x256xf32>
    %1 = vector.shape_cast %0 : vector<1x2x256xf32> to vector<2x256xf32>
    %c0_2 = arith.constant 0 : index
    %c0_3 = arith.constant 0 : index
    %c0_4 = arith.constant 0 : index
    %2 = vector.load %arg2[%c0_2, %c0_3, %c0_4] : memref<1x256x192xf32, #tpu.memory_space<vmem>>, vector<1x256x192xf32>
    %3 = vector.shape_cast %2 : vector<1x256x192xf32> to vector<256x192xf32>
    %cst = arith.constant dense<0.000000e+00> : vector<2x192xf32>
    %4 = tpu.matmul %1, %3, %cst {dimension_numbers = #tpu.dot_dimension_numbers<[1], [0], [0], [1], [0, 0, 1, 1], [], []>} : vector<2x256xf32>, vector<256x192xf32>, vector<2x192xf32> -> vector<2x192xf32>
    %c0_5 = arith.constant 0 : index
    %c0_6 = arith.constant 0 : index
    %c0_7 = arith.constant 0 : index
    %5 = vector.load %arg3[%c0_5, %c0_6, %c0_7] : memref<1x2x192xf32, #tpu.memory_space<vmem>>, vector<1x2x192xf32>
    %6 = vector.shape_cast %5 : vector<1x2x192xf32> to vector<2x192xf32>
    %7 = vector.shape_cast %4 : vector<2x192xf32> to vector<1x2x192xf32>
    tpu.vector_store %arg3[%c0_5, %c0_6, %c0_7], %7 {strides = array<i32>} : memref<1x2x192xf32, #tpu.memory_space<vmem>>, vector<1x2x192xf32>,
    return
  }
  func.func @transform_0(%arg0: i32) -> (i32, i32, i32) {
    %c0_i32 = arith.constant 0 : i32
    %c0_i32_0 = arith.constant 0 : i32
    %c0_i32_1 = arith.constant 0 : i32
    return %arg0, %c0_i32, %c0_i32_0 : i32, i32, i32
  }
  func.func @transform_1(%arg0: i32) -> (i32, i32, i32) {
    %c0_i32 = arith.constant 0 : i32
    %c0_i32_0 = arith.constant 0 : i32
    %c0_i32_1 = arith.constant 0 : i32
    return %arg0, %c0_i32, %c0_i32_0 : i32, i32, i32
  }
  func.func @transform_2(%arg0: i32) -> (i32, i32, i32) {
    %c0_i32 = arith.constant 0 : i32
    %c0_i32_0 = arith.constant 0 : i32
    %c0_i32_1 = arith.constant 0 : i32
    return %arg0, %c0_i32, %c0_i32_0 : i32, i32, i32
  }
}

</mosaic_0001>

<bundles_post_ra>
// kernel: reverse.0
= control target key start
LH: loop header
LB: loop body
LE: loop exit
PB: predicated region body
PF: predicated region fallthrough
CT: control target
= control target key end

     0   :  { %v63_v3 = vlaneseq  ;;  %v56_v7 = vld [vmem:[#allocation0 + $0x7] ss:$-1 sm:$0xff]  ;;  %v70_v9 = vld [vmem:[#allocation0 + $0x17] ss:$-1 sm:$0xff]  ;;  %s265_s0 = inlined_call_operand.vmem [shape: f32[2,3,16,7], index: 0, kind: input, shape index: {}]   ;;  %s266_s1 = inlined_call_operand.vmem [shape: f32[2,3,16,7], index: 1, kind: output, shape index: {}]  }
   0x1   :  { %v40_v0 = vld [vmem:[%s265_s0] sm:$0xff]  ;;  %v42_v1 = vld [vmem:[%s265_s0 + $0x8] sm:$0xff]  ;;  %v44_v2 = vld [vmem:[%s265_s0 + $0x10] sm:$0xff]  ;;  %v57_v10 = vrot.slane %v56_v7, 1  ;;  %v71_v11 = vrot.slane %v70_v9, 1 }
   0x2   :  { %41 = vst [vmem:[#allocation0 + $0x8] sm:$0xff] %v40_v0  ;;  %43 = vst [vmem:[#allocation0 + $0x18] sm:$0xff] %v42_v1  ;;  %v46_v4 = vld [vmem:[%s265_s0 + $0x18] sm:$0xff]  ;;  %v48_v5 = vld [vmem:[%s265_s0 + $0x20] sm:$0xff]  ;;  %v64_v8 = vshrl.u32 %v63_v3, 7 }
   0x3   :  { %45 = vst [vmem:[#allocation0 + $0x28] sm:$0xff] %v44_v2  ;;  %v50_v6 = vld [vmem:[%s265_s0 + $0x28] sm:$0xff]  ;;  %47 = vst [vmem:[#allocation0 + $0x38] sm:$0xff] %v46_v4  ;;  %v84_v12 = vld [vmem:[#allocation0 + $0x27] ss:$-1 sm:$0xff] }
   0x4   :  { %49 = vst [vmem:[#allocation0 + $0x48] sm:$0xff] %v48_v5  ;;  %51 = vst [vmem:[#allocation0 + $0x58] sm:$0xff] %v50_v6  ;;  %v98_v13 = vld [vmem:[#allocation0 + $0x37] ss:$-1 sm:$0xff]  ;;  %v85_v14 = vrot.slane %v84_v12, 1  ;;  %vm65_vm0 = vcmp.lt.s32.totalorder %v64_v8, 7 }
   0x5   :  { %v99_v15 = vrot.slane %v98_v13, 1  ;;  %v112_v16 = vld [vmem:[#allocation0 + $0x47] ss:$-1 sm:$0xff]  ;;  %58 = vst [vmem:[#allocation1] sm:$0xff] %v57_v10  ;;  %72 = vst [vmem:[#allocation1 + $0x8] sm:$0xff] %v71_v11 }
   0x6   :  { %v113_v17 = vrot.slane %v112_v16, 1  ;;  %v126_v18 = vld [vmem:[#allocation0 + $0x57] ss:$-1 sm:$0xff]  ;;  %86 = vst [vmem:[#allocation1 + $0x10] sm:$0xff] %v85_v14 }
   0x7   :  { %100 = vst [vmem:[#allocation1 + $0x18] sm:$0xff] %v99_v15  ;;  %v127_v19 = vrot.slane %v126_v18, 1 }
   0x8   :  { %114 = vst [vmem:[#allocation1 + $0x20] sm:$0xff] %v113_v17 }
   0x9   :  { %v61_v20 = vld [vmem:[#allocation0 + $0xf] ss:$-1 sm:$0xff]  ;;  %v75_v21 = vld [vmem:[#allocation0 + $0x1f] ss:$-1 sm:$0xff]  ;;  %128 = vst [vmem:[#allocation1 + $0x28] sm:$0xff] %v127_v19 }
   0xa   :  { %v89_v22 = vld [vmem:[#allocation0 + $0x2f] ss:$-1 sm:$0xff]  ;;  %v62_v23 = vrot.slane %v61_v20, 1  ;;  %v76_v24 = vrot.slane %v75_v21, 1  ;;  %v103_v26 = vld [vmem:[#allocation0 + $0x3f] ss:$-1 sm:$0xff] }
   0xb   :  { %v90_v25 = vrot.slane %v89_v22, 1  ;;  %v104_v27 = vrot.slane %v103_v26, 1  ;;  %v117_v28 = vld [vmem:[#allocation0 + $0x4f] ss:$-1 sm:$0xff]  ;;  %v131_v29 = vld [vmem:[#allocation0 + $0x5f] ss:$-1 sm:$0xff] }
   0xc   :  { %66 = vst.msk [vmem:[#allocation1] sm:$0xff] %vm65_vm0, %v62_v23  ;;  %80 = vst.msk [vmem:[#allocation1 + $0x8] sm:$0xff] %vm65_vm0, %v76_v24  ;;  %v118_v30 = vrot.slane %v117_v28, 1  ;;  %v132_v31 = vrot.slane %v131_v29, 1 }
   0xd   :  { %94 = vst.msk [vmem:[#allocation1 + $0x10] sm:$0xff] %vm65_vm0, %v90_v25  ;;  %108 = vst.msk [vmem:[#allocation1 + $0x18] sm:$0xff] %vm65_vm0, %v104_v27 }
   0xe   :  { %122 = vst.msk [vmem:[#allocation1 + $0x20] sm:$0xff] %vm65_vm0, %v118_v30  ;;  %136 = vst.msk [vmem:[#allocation1 + $0x28] sm:$0xff] %vm65_vm0, %v132_v31 }
  0x13   :  { %v174_v32 = vld [vmem:[#allocation1] sm:$0xff]  ;;  %v176_v33 = vld [vmem:[#allocation1 + $0x8] sm:$0xff] }
  0x14   :  { %v178_v34 = vld [vmem:[#allocation1 + $0x10] sm:$0xff]  ;;  %175 = vst [vmem:[%s266_s1] sm:$0xff] %v174_v32  ;;  %177 = vst [vmem:[%s266_s1 + $0x8] sm:$0xff] %v176_v33  ;;  %v180_v35 = vld [vmem:[#allocation1 + $0x18] sm:$0xff] }
  0x15   :  { %179 = vst [vmem:[%s266_s1 + $0x10] sm:$0xff] %v178_v34  ;;  %181 = vst [vmem:[%s266_s1 + $0x18] sm:$0xff] %v180_v35  ;;  %v182_v36 = vld [vmem:[#allocation1 + $0x20] sm:$0xff]  ;;  %v184_v37 = vld [vmem:[#allocation1 + $0x28] sm:$0xff] }
  0x16   :  { %183 = vst [vmem:[%s266_s1 + $0x20] sm:$0xff] %v182_v36  ;;  %185 = vst [vmem:[%s266_s1 + $0x28] sm:$0xff] %v184_v37 }

// kernel: spectral_conv2d.1
= control target key start
LH: loop header
LB: loop body
LE: loop exit
PB: predicated region body
PF: predicated region fallthrough
CT: control target
= control target key end

     0   :  { %vm169_vm0 = vcmask 1041408   ;;  %vm170_vm1 = vcmask 519170   ;;  %s462_s1 = inlined_call_operand.vmem [shape: f32[1,256,192], index: 1, kind: input, shape index: {}]   ;;  %s463_s0 = inlined_call_operand.vmem [shape: f32[1,2,256], index: 0, kind: input, shape index: {}]   ;;  %s464_s2 = inlined_call_operand.vmem [shape: f32[1,2,192], index: 2, kind: output, shape index: {}]  }
   0x1   :  { %v13_v0 = vld [vmem:[%s462_s1 + $0x8] sm:$0xff]  ;;  %v15_v1 = vld [vmem:[%s462_s1 + $0x18] sm:$0xff]  ;;  %v12_v2 = vld [vmem:[%s462_s1] sm:$0xff] }
   0x2   :  { %v178_v3 = vpack.c.bf16 %v15_v1, %v13_v0  ;;  %v14_v4 = vld [vmem:[%s462_s1 + $0x10] sm:$0xff]  ;;  %v17_v5 = vld [vmem:[%s462_s1 + $0x28] sm:$0xff]  ;;  %v19_v6 = vld [vmem:[%s462_s1 + $0x38] sm:$0xff] }
   0x3   :  { %v180_v7 = vpack.c.bf16 %v14_v4, %v12_v2  ;;  %v182_v8 = vpack.c.bf16 %v19_v6, %v17_v5  ;;  %v16_v9 = vld [vmem:[%s462_s1 + $0x20] sm:$0xff]  ;;  %v18_v10 = vld [vmem:[%s462_s1 + $0x30] sm:$0xff]  ;;  %v21_v11 = vld [vmem:[%s462_s1 + $0x48] sm:$0xff] }
   0x4   :  { %179 = vmatprep.subr.bf16.mxu0 %v178_v3  ;;  %v23_v12 = vld [vmem:[%s462_s1 + $0x58] sm:$0xff]  ;;  %v184_v13 = vpack.c.bf16 %v18_v10, %v16_v9  ;;  %v20_v15 = vld [vmem:[%s462_s1 + $0x40] sm:$0xff]  ;;  %v22_v16 = vld [vmem:[%s462_s1 + $0x50] sm:$0xff] }
   0x5   :  { %181 = vmatpush1.bf16.msra.mxu0 %v180_v7  ;;  %v186_v14 = vpack.c.bf16 %v23_v12, %v21_v11  ;;  %v25_v17 = vld [vmem:[%s462_s1 + $0x68] sm:$0xff]  ;;  %v27_v18 = vld [vmem:[%s462_s1 + $0x78] sm:$0xff]  ;;  %v188_v19 = vpack.c.bf16 %v22_v16, %v20_v15  ;;  %v24_v21 = vld [vmem:[%s462_s1 + $0x60] sm:$0xff] }
   0x6   :  { %183 = vmatprep.subr.bf16.mxu0 %v182_v8  ;;  %v190_v20 = vpack.c.bf16 %v27_v18, %v25_v17  ;;  %v26_v22 = vld [vmem:[%s462_s1 + $0x70] sm:$0xff]  ;;  %v29_v23 = vld [vmem:[%s462_s1 + $0x88] sm:$0xff]  ;;  %v31_v24 = vld [vmem:[%s462_s1 + $0x98] sm:$0xff] }
   0x7   :  { %v192_v25 = vpack.c.bf16 %v26_v22, %v24_v21  ;;  %v194_v26 = vpack.c.bf16 %v31_v24, %v29_v23  ;;  %v28_v27 = vld [vmem:[%s462_s1 + $0x80] sm:$0xff]  ;;  %v30_v28 = vld [vmem:[%s462_s1 + $0x90] sm:$0xff]  ;;  %v33_v29 = vld [vmem:[%s462_s1 + $0xa8] sm:$0xff] }
   0x8   :  { %v35_v30 = vld [vmem:[%s462_s1 + $0xb8] sm:$0xff]  ;;  %v196_v31 = vpack.c.bf16 %v30_v28, %v28_v27  ;;  %v32_v33 = vld [vmem:[%s462_s1 + $0xa0] sm:$0xff]  ;;  %v34_v34 = vld [vmem:[%s462_s1 + $0xb0] sm:$0xff] }
   0x9   :  { %185 = vmatpush1.bf16.msra.mxu0 %v184_v13  ;;  %v198_v32 = vpack.c.bf16 %v35_v30, %v33_v29  ;;  %v37_v35 = vld [vmem:[%s462_s1 + $0xc8] sm:$0xff]  ;;  %v39_v36 = vld [vmem:[%s462_s1 + $0xd8] sm:$0xff]  ;;  %v200_v37 = vpack.c.bf16 %v34_v34, %v32_v33  ;;  %v36_v39 = vld [vmem:[%s462_s1 + $0xc0] sm:$0xff]  ;;  %v243_v34 = vmov 1983009808  }
   0xa   :  { %187 = vmatprep.subr.bf16.mxu0 %v186_v14  ;;  %v202_v38 = vpack.c.bf16 %v39_v36, %v37_v35  ;;  %v38_v40 = vld [vmem:[%s462_s1 + $0xd0] sm:$0xff]  ;;  %v346_v41 = vld.sshfl [vmem:[%s463_s0] sm:$0x33 pattern:$0x76325410]  ;;  %v41_v42 = vld [vmem:[%s462_s1 + $0xe8] sm:$0xff]  ;;  %v162_v35 = vunpack.c.l.s4 %v243_v34  ;;  %v164_v36 = vlaneseq }
   0xb   :  { %v43_v43 = vld [vmem:[%s462_s1 + $0xf8] sm:$0xff]  ;;  %v84_v44 = vcombine.high %v346_v41, %v346_v41  ;;  %v204_v45 = vpack.c.bf16 %v38_v40, %v36_v39  ;;  %v40_v47 = vld [vmem:[%s462_s1 + $0xe0] sm:$0xff]  ;;  %v42_v48 = vld [vmem:[%s462_s1 + $0xf0] sm:$0xff] }
   0xc   :  { %v206_v46 = vpack.c.bf16 %v43_v43, %v41_v42  ;;  %v45_v49 = vld [vmem:[%s462_s1 + $0x108] sm:$0xff]  ;;  %v47_v50 = vld [vmem:[%s462_s1 + $0x118] sm:$0xff]  ;;  %v208_v51 = vpack.c.bf16 %v42_v48, %v40_v47  ;;  %v44_v53 = vld [vmem:[%s462_s1 + $0x100] sm:$0xff] }
   0xd   :  { %189 = vmatpush1.bf16.msra.mxu0 %v188_v19  ;;  %151 = vmatprep.mubr.f32.mxu0 %v84_v44  ;;  %v210_v52 = vpack.c.bf16 %v47_v50, %v45_v49  ;;  %v46_v54 = vld [vmem:[%s462_s1 + $0x110] sm:$0xff]  ;;  %v49_v55 = vld [vmem:[%s462_s1 + $0x128] sm:$0xff]  ;;  %v51_v56 = vld [vmem:[%s462_s1 + $0x138] sm:$0xff] }
   0xe   :  { %191 = vmatprep.subr.bf16.mxu0 %v190_v20  ;;  %v212_v57 = vpack.c.bf16 %v46_v54, %v44_v53  ;;  %v214_v58 = vpack.c.bf16 %v51_v56, %v49_v55  ;;  %v48_v59 = vld [vmem:[%s462_s1 + $0x120] sm:$0xff]  ;;  %v50_v60 = vld [vmem:[%s462_s1 + $0x130] sm:$0xff]  ;;  %v53_v61 = vld [vmem:[%s462_s1 + $0x148] sm:$0xff] }
   0xf   :  { %v55_v62 = vld [vmem:[%s462_s1 + $0x158] sm:$0xff]  ;;  %v216_v63 = vpack.c.bf16 %v50_v60, %v48_v59  ;;  %v52_v1 = vld [vmem:[%s462_s1 + $0x140] sm:$0xff]  ;;  %v54_v2 = vld [vmem:[%s462_s1 + $0x150] sm:$0xff] }
  0x10   :  { %v218_v0 = vpack.c.bf16 %v55_v62, %v53_v61  ;;  %v57_v3 = vld [vmem:[%s462_s1 + $0x168] sm:$0xff]  ;;  %v59_v4 = vld [vmem:[%s462_s1 + $0x178] sm:$0xff]  ;;  %v220_v5 = vpack.c.bf16 %v54_v2, %v52_v1  ;;  %v56_v7 = vld [vmem:[%s462_s1 + $0x160] sm:$0xff] }
  0x11   :  { %193 = vmatpush1.bf16.msra.mxu0 %v192_v25  ;;  %v222_v6 = vpack.c.bf16 %v59_v4, %v57_v3  ;;  %v58_v8 = vld [vmem:[%s462_s1 + $0x170] sm:$0xff]  ;;  %v61_v9 = vld [vmem:[%s462_s1 + $0x188] sm:$0xff]  ;;  %v63_v10 = vld [vmem:[%s462_s1 + $0x198] sm:$0xff] }
  0x12   :  { %195 = vmatprep.subr.bf16.mxu0 %v194_v26  ;;  %v224_v11 = vpack.c.bf16 %v58_v8, %v56_v7  ;;  %v226_v12 = vpack.c.bf16 %v63_v10, %v61_v9  ;;  %v60_v13 = vld [vmem:[%s462_s1 + $0x180] sm:$0xff]  ;;  %v62_v14 = vld [vmem:[%s462_s1 + $0x190] sm:$0xff]  ;;  %v65_v15 = vld [vmem:[%s462_s1 + $0x1a8] sm:$0xff] }
  0x13   :  { %v67_v16 = vld [vmem:[%s462_s1 + $0x1b8] sm:$0xff]  ;;  %v228_v17 = vpack.c.bf16 %v62_v14, %v60_v13  ;;  %v64_v19 = vld [vmem:[%s462_s1 + $0x1a0] sm:$0xff]  ;;  %v66_v20 = vld [vmem:[%s462_s1 + $0x1b0] sm:$0xff] }
  0x14   :  { %v230_v18 = vpack.c.bf16 %v67_v16, %v65_v15  ;;  %v69_v21 = vld [vmem:[%s462_s1 + $0x1c8] sm:$0xff]  ;;  %v71_v22 = vld [vmem:[%s462_s1 + $0x1d8] sm:$0xff]  ;;  %v232_v23 = vpack.c.bf16 %v66_v20, %v64_v19  ;;  %v68_v25 = vld [vmem:[%s462_s1 + $0x1c0] sm:$0xff] }
  0x15   :  { %197 = vmatpush1.bf16.msra.mxu0 %v196_v31  ;;  %v234_v24 = vpack.c.bf16 %v71_v22, %v69_v21  ;;  %v70_v26 = vld [vmem:[%s462_s1 + $0x1d0] sm:$0xff]  ;;  %v73_v27 = vld [vmem:[%s462_s1 + $0x1e8] sm:$0xff]  ;;  %v75_v28 = vld [vmem:[%s462_s1 + $0x1f8] sm:$0xff] }
  0x16   :  { %199 = vmatprep.subr.bf16.mxu0 %v198_v32  ;;  %v236_v29 = vpack.c.bf16 %v70_v26, %v68_v25  ;;  %v238_v30 = vpack.c.bf16 %v75_v28, %v73_v27  ;;  %v72_v31 = vld [vmem:[%s462_s1 + $0x1e0] sm:$0xff]  ;;  %v74_v32 = vld [vmem:[%s462_s1 + $0x1f0] sm:$0xff]  ;;  %vm171_vm2 = vmor %vm170_vm1, %vm169_vm0 }
  0x17   :  { %v240_v33 = vpack.c.bf16 %v74_v32, %v72_v31 }
  0x19   :  { %201 = vmatpush1.bf16.msra.mxu0 %v200_v37  ;;  %v163_v37 = vunpack.c.0.s8 %v162_v35 }
  0x1a   :  { %203 = vmatprep.subr.bf16.mxu0 %v202_v38  ;;  %v165_v38 = vshrl.u32 %v164_v36, 7 }
  0x1c   :  { %v166_v40 = vsub.s32 %v163_v37, %v165_v38 }
  0x1d   :  { %205 = vmatpush1.bf16.msra.mxu0 %v204_v45 }
  0x1e   :  { %207 = vmatprep.subr.bf16.mxu0 %v206_v46 }
  0x21   :  { %209 = vmatpush1.bf16.msra.mxu0 %v208_v51 }
  0x22   :  { %211 = vmatprep.subr.bf16.mxu0 %v210_v52 }
  0x25   :  { %213 = vmatpush1.bf16.msra.mxu0 %v212_v57 }
  0x26   :  { %215 = vmatprep.subr.bf16.mxu0 %v214_v58 }
  0x29   :  { %217 = vmatpush1.bf16.msra.mxu0 %v216_v63 }
  0x2a   :  { %219 = vmatprep.subr.bf16.mxu0 %v218_v0 }
  0x2d   :  { %221 = vmatpush1.bf16.msra.mxu0 %v220_v5 }
  0x2e   :  { %223 = vmatprep.subr.bf16.mxu0 %v222_v6 }
  0x31   :  { %225 = vmatpush1.bf16.msra.mxu0 %v224_v11 }
  0x32   :  { %227 = vmatprep.subr.bf16.mxu0 %v226_v12 }
  0x35   :  { %229 = vmatpush1.bf16.msra.mxu0 %v228_v17 }
  0x36   :  { %231 = vmatprep.subr.bf16.mxu0 %v230_v18 }
  0x39   :  { %233 = vmatpush1.bf16.msra.mxu0 %v232_v23 }
  0x3a   :  { %235 = vmatprep.subr.bf16.mxu0 %v234_v24 }
  0x3d   :  { %237 = vmatpush1.bf16.msra.mxu0 %v236_v29 }
  0x3e   :  { %239 = vmatprep.subr.bf16.mxu0 %v238_v30 }
  0x41   :  { %241 = vmatpush1.bf16.msra.mxu0 %v240_v33 }
  0x44   :  { %152 = vmatmul.mubr.f32.vlgmr.msra.gmra.mrb[0].mxu0 %v346_v41 }
 0x117   :  { %v153_v39 = vpop.f32.mrb[0].mxu0 }
 0x118   :  { %v155_v42 = vpop.f32.mrb[1].mxu0 }
 0x119   :  { %v160_v43 = vcombine.low %v153_v39, %v155_v42 }
 0x11b   :  { %v167_v44 = vrot.slane %v160_v43, %v166_v40 }
 0x11d   :  { %172 = vst.msk [vmem:[%s464_s2] sm:$0xf] %vm171_vm2, %v167_v44 }

</bundles_post_ra>
